<compile_context>
chip_gen: v6e
topology: v6e:2x2x1
jax: 0.10.0
libtpu: 0.0.40
codegen_flags: <defaults>
</compile_context>

<pallas_src>
import functools

import jax
import jax.numpy as jnp
from jax.experimental import pallas as pl
from jax.experimental.pallas import tpu as pltpu

LANE = 128  # lane width


def _cdiv(a, b):
    return -(-a // b)


def _round_up(x, m):
    return _cdiv(x, m) * m


def mf_kernel(e_ref, r_ref, eb_ref, rb_ref, gb_ref, scores_ref, reg_ref, *,
              n_valid):
    """One batch tile.

    e_ref, r_ref   : (D, sub, 128) f32 -- batch rides lanes, D on leading axis
    eb_ref, rb_ref : (sub, 128) f32
    gb_ref         : (1,) f32 in SMEM
    scores_ref     : (sub, 128) f32
    reg_ref        : (sub, 128) f32 (per-row regularizer partials)
    n_valid        : true (unpadded) batch size, baked in statically.
    """
    e = e_ref[...]
    r = r_ref[...]
    eb = eb_ref[...]
    rb = rb_ref[...]
    gb = gb_ref[0]

    # scores = sigmoid(sum_d(e*r) + e_bias + r_bias + global_bias)
    dot = jnp.sum(e * r, axis=0)                         # (sub, 128) VPU adds
    scores_ref[...] = jax.nn.sigmoid(dot + eb + rb + gb)

    # Per-row regularizer partials (lane-dense); padded rows masked to 0.
    sub, lanes = eb.shape
    s_idx = jax.lax.broadcasted_iota(jnp.int32, (sub, lanes), 0)
    l_idx = jax.lax.broadcasted_iota(jnp.int32, (sub, lanes), 1)
    gidx = pl.program_id(0) * (sub * lanes) + s_idx * lanes + l_idx
    valid = (gidx < n_valid).astype(jnp.float32)

    row_reg = (jnp.sum(e * e, axis=0) + jnp.sum(r * r, axis=0)
               + eb * eb + rb * rb)
    reg_ref[...] = row_reg * valid


def _choose_tiling(B, D):
    """Pick (tile_chunks, grid); tile_chunks counts 128-row lane chunks."""
    b_chunks = _cdiv(B, LANE)
    # VMEM budget for the two double-buffered embedding inputs (~8 MiB),
    # leaving ample headroom for elementwise temps even on v7x (64 MiB core).
    max_chunks = (8 * 1024 * 1024) // (2 * 2 * D * 4 * LANE)
    max_chunks = max(8, min(256, (max_chunks // 8) * 8))
    if b_chunks <= 8:
        return b_chunks, 1                  # single small tile
    # >= 2 grid steps (v7x megacore) and tile_chunks a multiple of 8 so the
    # (sublane, lane) block dims stay (8, 128)-conforming.
    tile_chunks = min(max_chunks, _round_up(_cdiv(b_chunks, 2), 8))
    grid = _cdiv(b_chunks, tile_chunks)
    return tile_chunks, grid


@jax.jit
def mf_apply(entity_idx, reaction_idx, entity_emb, reaction_emb,
             entity_bias, reaction_bias, global_bias):
    """Full MF forward: XLA gathers (fused) + Pallas scoring/reg kernel."""
    B = entity_idx.shape[0]
    D = entity_emb.shape[1]

    tile_chunks, grid = _choose_tiling(B, D)
    tile_b = tile_chunks * LANE
    b_pad = grid * tile_b
    rows = b_pad // LANE

    pad = b_pad - B
    if pad:
        # Pad the cheap int32 index vectors, NOT the gathered (B, D) data.
        # Padded rows gather real row 0 and are masked inside the kernel.
        entity_idx = jnp.pad(entity_idx, (0, pad))
        reaction_idx = jnp.pad(reaction_idx, (0, pad))

    idx_e = entity_idx.reshape(rows, LANE)
    idx_r = reaction_idx.reshape(rows, LANE)

    # Gather + lane-dense layout: (D, rows, 128); batch index = chunk*128+lane.
    e3 = jnp.transpose(entity_emb[idx_e], (2, 0, 1))
    r3 = jnp.transpose(reaction_emb[idx_r], (2, 0, 1))
    eb2 = entity_bias[idx_e, 0]                       # (rows, 128)
    rb2 = reaction_bias[idx_r, 0]
    gb = global_bias.reshape(1).astype(jnp.float32)

    kernel = functools.partial(mf_kernel, n_valid=B)

    scores2d, reg_rows = pl.pallas_call(
        kernel,
        grid=(grid,),
        out_shape=(
            jax.ShapeDtypeStruct((rows, LANE), jnp.float32),   # scores
            jax.ShapeDtypeStruct((rows, LANE), jnp.float32),   # reg partials
        ),
        in_specs=[
            pl.BlockSpec((D, tile_chunks, LANE), lambda i: (0, i, 0)),  # e_emb
            pl.BlockSpec((D, tile_chunks, LANE), lambda i: (0, i, 0)),  # r_emb
            pl.BlockSpec((tile_chunks, LANE), lambda i: (i, 0)),        # e_bias
            pl.BlockSpec((tile_chunks, LANE), lambda i: (i, 0)),        # r_bias
            pl.BlockSpec(memory_space=pltpu.MemorySpace.SMEM),          # g_bias
        ],
        out_specs=(
            pl.BlockSpec((tile_chunks, LANE), lambda i: (i, 0)),        # scores
            pl.BlockSpec((tile_chunks, LANE), lambda i: (i, 0)),        # reg
        ),
        compiler_params=pltpu.CompilerParams(
            dimension_semantics=("parallel",),
            vmem_limit_bytes=32 * 1024 * 1024,
        ),
    )(e3, r3, eb2, rb2, gb)

    scores = scores2d.reshape(b_pad)[:B]
    regularizer = jnp.sum(reg_rows) / B   # padded rows contribute exactly 0
    return scores, regularizer


class MFPallas:
    """JAX/Pallas port of the PyTorch MF module's forward pass."""

    def __init__(self, n_entity, n_reaction, emb_dim, stddev=0.1, seed=0):
        key = jax.random.PRNGKey(seed)
        k_e, k_r = jax.random.split(key)
        self.entity_emb = stddev * jax.random.normal(
            k_e, (n_entity, emb_dim), jnp.float32)
        self.reaction_emb = stddev * jax.random.normal(
            k_r, (n_reaction, emb_dim), jnp.float32)
        # Biases initialized to zero (matching .fill_(0.0) in the module).
        # NOTE: reaction_bias table has n_entity rows but is indexed by
        # reaction ids -- faithful to the original module's quirk; only safe
        # when all reaction ids < n_entity.
        self.entity_bias = jnp.zeros((n_entity, 1), jnp.float32)
        self.reaction_bias = jnp.zeros((n_entity, 1), jnp.float32)
        self.global_bias = jnp.zeros((1,), jnp.float32)

    def forward(self, batch_data):
        entity, reaction = batch_data  # int32 index vectors, shape (B,)
        return mf_apply(entity, reaction, self.entity_emb, self.reaction_emb,
                        self.entity_bias, self.reaction_bias, self.global_bias)


def _reference(model, entity, reaction):
    e_emb = model.entity_emb[entity]
    r_emb = model.reaction_emb[reaction]
    e_bias = model.entity_bias[entity, 0]
    r_bias = model.reaction_bias[reaction, 0]
    scores = jax.nn.sigmoid(jnp.sum(e_emb * r_emb, axis=1)
                            + e_bias + r_bias + model.global_bias[0])
    reg = (jnp.sum(e_emb ** 2) + jnp.sum(r_emb ** 2)
           + jnp.sum(e_bias ** 2) + jnp.sum(r_bias ** 2)) / e_emb.shape[0]
    return scores, reg


if __name__ == "__main__":
    n_entity, n_reaction, emb_dim = 64, 16, 32

    model = MFPallas(n_entity, n_reaction, emb_dim, stddev=0.1, seed=0)

    # Exercise the bias path with nonzero values (module default is zeros).
    key = jax.random.PRNGKey(0)
    k1, k2, k3, k4 = jax.random.split(key, 4)
    model.entity_bias = 0.05 * jax.random.normal(k3, (n_entity, 1), jnp.float32)
    model.reaction_bias = 0.05 * jax.random.normal(k4, (n_entity, 1),
                                                   jnp.float32)
    model.global_bias = jnp.array([0.1], jnp.float32)

    # batch=8 : single small tile; batch=1200 : multi-step parallel grid with
    # index padding + in-kernel regularizer masking.
    for batch in (8, 1200):
        kk1, kk2 = jax.random.split(jax.random.fold_in(key, batch))
        entity = jax.random.randint(kk1, (batch,), 0, n_entity,
                                    dtype=jnp.int32)
        reaction = jax.random.randint(kk2, (batch,), 0, n_reaction,
                                      dtype=jnp.int32)

        scores, regularizer = model.forward((entity, reaction))
        jax.block_until_ready((scores, regularizer))

        ref_scores, ref_reg = _reference(model, entity, reaction)
        assert scores.shape == (batch,)
        assert jnp.allclose(scores, ref_scores, atol=1e-5, rtol=1e-5)
        assert jnp.allclose(regularizer, ref_reg, atol=1e-5, rtol=1e-5)

    print("KERNEL_OK")
</pallas_src>

<mosaic_0001>
module attributes {stable_mosaic.version = 11 : i64} {
  func.func @mf_kernel(%arg0: i32, %arg1: memref<32x1x128xf32, #tpu.memory_space<vmem>>, %arg2: memref<32x1x128xf32, #tpu.memory_space<vmem>>, %arg3: memref<1x128xf32, #tpu.memory_space<vmem>>, %arg4: memref<1x128xf32, #tpu.memory_space<vmem>>, %arg5: memref<1xf32, #tpu.memory_space<smem>>, %arg6: memref<1x128xf32, #tpu.memory_space<vmem>>, %arg7: memref<1x128xf32, #tpu.memory_space<vmem>>) attributes {dimension_semantics = [#tpu.dimension_semantics<parallel>], iteration_bounds = array<i64: 1>, scalar_prefetch = 0 : i64, scratch_operands = 0 : i64, tpu.core_type = #tpu.core_type<tc>, window_params = [{transform_indices = @transform_0, window_bounds = array<i64: 32, 1, 128>}, {transform_indices = @transform_1, window_bounds = array<i64: 32, 1, 128>}, {transform_indices = @transform_2, window_bounds = array<i64: 1, 128>}, {transform_indices = @transform_3, window_bounds = array<i64: 1, 128>}, {transform_indices = @transform_4, window_bounds = array<i64: 1>}, {transform_indices = @transform_5, window_bounds = array<i64: 1, 128>}, {transform_indices = @transform_6, window_bounds = array<i64: 1, 128>}]} {
    %c0 = arith.constant 0 : index
    %c0_0 = arith.constant 0 : index
    %c0_1 = arith.constant 0 : index
    %0 = vector.load %arg1[%c0, %c0_0, %c0_1] : memref<32x1x128xf32, #tpu.memory_space<vmem>>, vector<32x1x128xf32>
    %c0_2 = arith.constant 0 : index
    %c0_3 = arith.constant 0 : index
    %c0_4 = arith.constant 0 : index
    %1 = vector.load %arg2[%c0_2, %c0_3, %c0_4] : memref<32x1x128xf32, #tpu.memory_space<vmem>>, vector<32x1x128xf32>
    %c0_5 = arith.constant 0 : index
    %c0_6 = arith.constant 0 : index
    %2 = vector.load %arg3[%c0_5, %c0_6] : memref<1x128xf32, #tpu.memory_space<vmem>>, vector<1x128xf32>
    %c0_7 = arith.constant 0 : index
    %c0_8 = arith.constant 0 : index
    %3 = vector.load %arg4[%c0_7, %c0_8] : memref<1x128xf32, #tpu.memory_space<vmem>>, vector<1x128xf32>
    %c0_9 = arith.constant 0 : index
    %4 = memref.load %arg5[%c0_9] : memref<1xf32, #tpu.memory_space<smem>>
    %5 = arith.mulf %0, %1 : vector<32x1x128xf32>
    %cst = arith.constant dense<0.000000e+00> : vector<1x128xf32>
    %6 = vector.multi_reduction <add>, %5, %cst [0] : vector<32x1x128xf32> to vector<1x128xf32>
    %7 = arith.addf %6, %2 : vector<1x128xf32>
    %8 = arith.addf %7, %3 : vector<1x128xf32>
    %9 = vector.broadcast %4 : f32 to vector<1x128xf32>
    %10 = arith.addf %8, %9 : vector<1x128xf32>
    %11 = arith.negf %10 : vector<1x128xf32>
    %12 = math.exp %11 : vector<1x128xf32>
    %cst_10 = arith.constant 1.000000e+00 : f32
    %13 = vector.broadcast %cst_10 : f32 to vector<1x128xf32>
    %14 = arith.addf %13, %12 : vector<1x128xf32>
    %15 = arith.divf %13, %14 : vector<1x128xf32>
    %c0_11 = arith.constant 0 : index
    %c0_12 = arith.constant 0 : index
    %16 = vector.load %arg6[%c0_11, %c0_12] : memref<1x128xf32, #tpu.memory_space<vmem>>, vector<1x128xf32>
    tpu.vector_store %arg6[%c0_11, %c0_12], %15 {strides = array<i32>} : memref<1x128xf32, #tpu.memory_space<vmem>>, vector<1x128xf32>,
    %17 = tpu.iota {dimensions = array<i32: 0>} : vector<1x128xi32>
    %18 = tpu.iota {dimensions = array<i32: 1>} : vector<1x128xi32>
    %c128_i32 = arith.constant 128 : i32
    %19 = arith.muli %arg0, %c128_i32 : i32
    %c128_i32_13 = arith.constant 128 : i32
    %20 = vector.broadcast %c128_i32_13 : i32 to vector<1x128xi32>
    %21 = arith.muli %17, %20 : vector<1x128xi32>
    %22 = vector.broadcast %19 : i32 to vector<1x128xi32>
    %23 = arith.addi %22, %21 : vector<1x128xi32>
    %24 = arith.addi %23, %18 : vector<1x128xi32>
    %c8_i32 = arith.constant 8 : i32
    %25 = vector.broadcast %c8_i32 : i32 to vector<1x128xi32>
    %26 = arith.cmpi slt, %24, %25 : vector<1x128xi32>
    %27 = arith.extui %26 : vector<1x128xi1> to vector<1x128xi32>
    %28 = arith.sitofp %27 : vector<1x128xi32> to vector<1x128xf32>
    %29 = arith.mulf %0, %0 : vector<32x1x128xf32>
    %cst_14 = arith.constant dense<0.000000e+00> : vector<1x128xf32>
    %30 = vector.multi_reduction <add>, %29, %cst_14 [0] : vector<32x1x128xf32> to vector<1x128xf32>
    %31 = arith.mulf %1, %1 : vector<32x1x128xf32>
    %cst_15 = arith.constant dense<0.000000e+00> : vector<1x128xf32>
    %32 = vector.multi_reduction <add>, %31, %cst_15 [0] : vector<32x1x128xf32> to vector<1x128xf32>
    %33 = arith.addf %30, %32 : vector<1x128xf32>
    %34 = arith.mulf %2, %2 : vector<1x128xf32>
    %35 = arith.addf %33, %34 : vector<1x128xf32>
    %36 = arith.mulf %3, %3 : vector<1x128xf32>
    %37 = arith.addf %35, %36 : vector<1x128xf32>
    %38 = arith.mulf %37, %28 : vector<1x128xf32>
    %c0_16 = arith.constant 0 : index
    %c0_17 = arith.constant 0 : index
    %39 = vector.load %arg7[%c0_16, %c0_17] : memref<1x128xf32, #tpu.memory_space<vmem>>, vector<1x128xf32>
    tpu.vector_store %arg7[%c0_16, %c0_17], %38 {strides = array<i32>} : memref<1x128xf32, #tpu.memory_space<vmem>>, vector<1x128xf32>,
    return
  }
  func.func @transform_0(%arg0: i32) -> (i32, i32, i32) {
    %c0_i32 = arith.constant 0 : i32
    %c0_i32_0 = arith.constant 0 : i32
    %c0_i32_1 = arith.constant 0 : i32
    return %c0_i32, %arg0, %c0_i32_0 : i32, i32, i32
  }
  func.func @transform_1(%arg0: i32) -> (i32, i32, i32) {
    %c0_i32 = arith.constant 0 : i32
    %c0_i32_0 = arith.constant 0 : i32
    %c0_i32_1 = arith.constant 0 : i32
    return %c0_i32, %arg0, %c0_i32_0 : i32, i32, i32
  }
  func.func @transform_2(%arg0: i32) -> (i32, i32) {
    %c0_i32 = arith.constant 0 : i32
    %c0_i32_0 = arith.constant 0 : i32
    return %arg0, %c0_i32 : i32, i32
  }
  func.func @transform_3(%arg0: i32) -> (i32, i32) {
    %c0_i32 = arith.constant 0 : i32
    %c0_i32_0 = arith.constant 0 : i32
    return %arg0, %c0_i32 : i32, i32
  }
  func.func @transform_4(%arg0: i32) -> i32 {
    %c0_i32 = arith.constant 0 : i32
    %c0_i32_0 = arith.constant 0 : i32
    return %c0_i32 : i32
  }
  func.func @transform_5(%arg0: i32) -> (i32, i32) {
    %c0_i32 = arith.constant 0 : i32
    %c0_i32_0 = arith.constant 0 : i32
    return %arg0, %c0_i32 : i32, i32
  }
  func.func @transform_6(%arg0: i32) -> (i32, i32) {
    %c0_i32 = arith.constant 0 : i32
    %c0_i32_0 = arith.constant 0 : i32
    return %arg0, %c0_i32 : i32, i32
  }
}

</mosaic_0001>

<bundles_post_ra>
// kernel: mf_apply.1
= control target key start
LH: loop header
LB: loop body
LE: loop exit
PB: predicated region body
PF: predicated region fallthrough
CT: control target
= control target key end

     0   :  { %vm122_vm0 = vcmask 1040384   ;;  %s1027_s0 = inlined_call_operand.vmem [shape: f32[32,1,128], index: 0, kind: input, shape index: {}]   ;;  %s1028_s1 = inlined_call_operand.vmem [shape: f32[32,1,128], index: 1, kind: input, shape index: {}]   ;;  %s1029_s2 = inlined_call_operand.vmem [shape: f32[1,128], index: 2, kind: input, shape index: {}]   ;;  %s1030_s3 = inlined_call_operand.vmem [shape: f32[1,128], index: 3, kind: input, shape index: {}]   ;;  %s1031_s4 = inlined_call_operand.<no memory space> [shape: f32[1], index: 4, kind: input, shape index: {}]   ;;  %s1032_s6 = inlined_call_operand.vmem [shape: f32[1,128], index: 6, kind: output, shape index: {1}]   ;;  %s1033_s5 = inlined_call_operand.vmem [shape: f32[1,128], index: 5, kind: output, shape index: {0}]  }
   0x1   :  { %v23_v0 = vld [vmem:[%s1027_s0] sm:$0x1]  ;;  %v24_v1 = vld [vmem:[%s1027_s0 + $0x1] sm:$0x1]  ;;  %v25_v2 = vld [vmem:[%s1027_s0 + $0x2] sm:$0x1] }
   0x2   :  { %v469_v3 = vld [vmem:[%s1028_s1] sm:$0x1]  ;;  %v474_v4 = vld [vmem:[%s1028_s1 + $0x1] sm:$0x1]  ;;  %v479_v5 = vld [vmem:[%s1028_s1 + $0x2] sm:$0x1]  ;;  %v209_v33 = vmul.f32 %v23_v0, %v23_v0  ;;  %v210_v38 = vmul.f32 %v24_v1, %v24_v1  ;;  %v211_v39 = vmul.f32 %v25_v2, %v25_v2 }
   0x3   :  { %v26_v6 = vld [vmem:[%s1027_s0 + $0x3] sm:$0x1]  ;;  %v90_v8 = vmul.f32 %v469_v3, %v23_v0  ;;  %v91_v9 = vmul.f32 %v474_v4, %v24_v1  ;;  %v92_v10 = vmul.f32 %v479_v5, %v25_v2  ;;  %v27_v11 = vld [vmem:[%s1027_s0 + $0x4] sm:$0x1]  ;;  %v28_v14 = vld [vmem:[%s1027_s0 + $0x5] sm:$0x1] }
   0x4   :  { %v487_v7 = vld [vmem:[%s1028_s1 + $0x3] sm:$0x1]  ;;  %v498_v12 = vld [vmem:[%s1028_s1 + $0x4] sm:$0x1]  ;;  %v507_v15 = vld [vmem:[%s1028_s1 + $0x5] sm:$0x1]  ;;  %v212_v43 = vmul.f32 %v26_v6, %v26_v6  ;;  %v213_v48 = vmul.f32 %v27_v11, %v27_v11  ;;  %v214_v56 = vmul.f32 %v28_v14, %v28_v14 }
   0x5   :  { %v93_v13 = vmul.f32 %v487_v7, %v26_v6  ;;  %v94_v16 = vmul.f32 %v498_v12, %v27_v11  ;;  %v123_v17 = vsel %vm122_vm0, %v90_v8, 0.0  ;;  %v124_v18 = vsel %vm122_vm0, %v91_v9, 0.0  ;;  %v29_v20 = vld [vmem:[%s1027_s0 + $0x6] sm:$0x1]  ;;  %v30_v25 = vld [vmem:[%s1027_s0 + $0x7] sm:$0x1] }
   0x6   :  { %v126_v19 = vsel %vm122_vm0, %v92_v10, 0.0  ;;  %v519_v21 = vld [vmem:[%s1028_s1 + $0x6] sm:$0x1]  ;;  %v125_v22 = vadd.f32 %v124_v18, %v123_v17  ;;  %v95_v23 = vmul.f32 %v507_v15, %v28_v14  ;;  %v529_v26 = vld [vmem:[%s1028_s1 + $0x7] sm:$0x1]  ;;  %v241_v50 = vsel %vm122_vm0, %v209_v33, 0.0 }
   0x7   :  { %v128_v24 = vsel %vm122_vm0, %v93_v13, 0.0  ;;  %v96_v28 = vmul.f32 %v519_v21, %v29_v20  ;;  %v130_v29 = vsel %vm122_vm0, %v94_v16, 0.0  ;;  %v31_v30 = vld [vmem:[%s1027_s0 + $0x8] sm:$0x1]  ;;  %v32_v34 = vld [vmem:[%s1027_s0 + $0x9] sm:$0x1]  ;;  %v97_v36 = vmul.f32 %v529_v26, %v30_v25 }
   0x8   :  { %v127_v27 = vadd.f32 %v126_v19, %v125_v22  ;;  %v539_v31 = vld [vmem:[%s1028_s1 + $0x8] sm:$0x1]  ;;  %v547_v35 = vld [vmem:[%s1028_s1 + $0x9] sm:$0x1]  ;;  %v132_v37 = vsel %vm122_vm0, %v95_v23, 0.0  ;;  %v242_v51 = vsel %vm122_vm0, %v210_v38, 0.0  ;;  %v215_v60 = vmul.f32 %v29_v20, %v29_v20 }
   0x9   :  { %v98_v41 = vmul.f32 %v539_v31, %v31_v30  ;;  %v134_v42 = vsel %vm122_vm0, %v96_v28, 0.0  ;;  %v33_v44 = vld [vmem:[%s1027_s0 + $0xa] sm:$0x1]  ;;  %v99_v46 = vmul.f32 %v547_v35, %v32_v34  ;;  %v136_v49 = vsel %vm122_vm0, %v97_v36, 0.0  ;;  %v34_v53 = vld [vmem:[%s1027_s0 + $0xb] sm:$0x1] }
   0xa   :  { %v129_v32 = vadd.f32 %v128_v24, %v127_v27  ;;  %v559_v45 = vld [vmem:[%s1028_s1 + $0xa] sm:$0x1]  ;;  %v244_v52 = vsel %vm122_vm0, %v211_v39, 0.0  ;;  %v572_v54 = vld [vmem:[%s1028_s1 + $0xb] sm:$0x1]  ;;  %v243_v57 = vadd.f32 %v242_v51, %v241_v50  ;;  %v246_v61 = vsel %vm122_vm0, %v212_v43, 0.0 }
   0xb   :  { %v100_v58 = vmul.f32 %v559_v45, %v33_v44  ;;  %v138_v59 = vsel %vm122_vm0, %v98_v41, 0.0  ;;  %v35_v62 = vld [vmem:[%s1027_s0 + $0xc] sm:$0x1]  ;;  %v216_v1 = vmul.f32 %v30_v25, %v30_v25  ;;  %v217_v2 = vmul.f32 %v31_v30, %v31_v30  ;;  %v36_v13 = vld [vmem:[%s1027_s0 + $0xd] sm:$0x1] }
   0xc   :  { %v131_v40 = vadd.f32 %v130_v29, %v129_v32  ;;  %v583_v63 = vld [vmem:[%s1028_s1 + $0xc] sm:$0x1]  ;;  %v245_v6 = vadd.f32 %v244_v52, %v243_v57  ;;  %v101_v8 = vmul.f32 %v572_v54, %v34_v53  ;;  %v140_v9 = vsel %vm122_vm0, %v99_v46, 0.0  ;;  %v594_v14 = vld [vmem:[%s1028_s1 + $0xd] sm:$0x1] }
   0xd   :  { %v218_v10 = vmul.f32 %v32_v34, %v32_v34  ;;  %v248_v11 = vsel %vm122_vm0, %v213_v48, 0.0  ;;  %v219_v17 = vmul.f32 %v33_v44, %v33_v44  ;;  %v596_v18 = vmul.f32 %v34_v53, %v34_v53  ;;  %v37_v20 = vld [vmem:[%s1027_s0 + $0xe] sm:$0x1]  ;;  %v38_v27 = vld [vmem:[%s1027_s0 + $0xf] sm:$0x1] }
   0xe   :  { %v133_v47 = vadd.f32 %v132_v37, %v131_v40  ;;  %v247_v19 = vadd.f32 %v246_v61, %v245_v6  ;;  %v102_v22 = vmul.f32 %v583_v63, %v35_v62  ;;  %v142_v23 = vsel %vm122_vm0, %v100_v58, 0.0  ;;  %v612_v28 = vld [vmem:[%s1028_s1 + $0xe] sm:$0x1]  ;;  %v39_v34 = vld [vmem:[%s1027_s0 + $0x10] sm:$0x1] }
   0xf   :  { %v603_v24 = vmul.f32 %v35_v62, %v35_v62  ;;  %v250_v25 = vsel %vm122_vm0, %v214_v56, 0.0  ;;  %v614_v30 = vmul.f32 %v36_v13, %v36_v13  ;;  %v616_v32 = vmul.f32 %v37_v20, %v37_v20  ;;  %v40_v36 = vld [vmem:[%s1027_s0 + $0x11] sm:$0x1]  ;;  %v41_v41 = vld [vmem:[%s1027_s0 + $0x12] sm:$0x1] }
  0x10   :  { %v135_v55 = vadd.f32 %v134_v42, %v133_v47  ;;  %v249_v33 = vadd.f32 %v248_v11, %v247_v19  ;;  %v103_v37 = vmul.f32 %v594_v14, %v36_v13  ;;  %v144_v38 = vsel %vm122_vm0, %v101_v8, 0.0  ;;  %v635_v42 = vld [vmem:[%s1028_s1 + $0xf] sm:$0x1]  ;;  %v42_v48 = vld [vmem:[%s1027_s0 + $0x13] sm:$0x1] }
  0x11   :  { %v626_v39 = vmul.f32 %v38_v27, %v38_v27  ;;  %v252_v40 = vsel %vm122_vm0, %v215_v60, 0.0  ;;  %v637_v44 = vmul.f32 %v39_v34, %v39_v34  ;;  %v639_v46 = vmul.f32 %v40_v36, %v40_v36  ;;  %v660_v56 = vld [vmem:[%s1028_s1 + $0x10] sm:$0x1]  ;;  %v669_v61 = vld [vmem:[%s1027_s0 + $0x16] sm:$0x1] }
  0x12   :  { %v137_v0 = vadd.f32 %v136_v49, %v135_v55  ;;  %v251_v47 = vadd.f32 %v250_v25, %v249_v33  ;;  %v43_v49 = vld [vmem:[%s1027_s0 + $0x14] sm:$0x1]  ;;  %v104_v50 = vmul.f32 %v612_v28, %v37_v20  ;;  %v146_v51 = vsel %vm122_vm0, %v102_v22, 0.0  ;;  %v655_v55 = vld [vmem:[%s1027_s0 + $0x15] sm:$0x1] }
  0x13   :  { %v649_v52 = vmul.f32 %v41_v41, %v41_v41  ;;  %v254_v53 = vsel %vm122_vm0, %v216_v1, 0.0  ;;  %v662_v58 = vmul.f32 %v42_v48, %v42_v48  ;;  %v674_v62 = vld [vmem:[%s1027_s0 + $0x17] sm:$0x1]  ;;  %v148_v1 = vsel %vm122_vm0, %v103_v37, 0.0  ;;  %v704_v25 = vld [vmem:[%s1027_s0 + $0x18] sm:$0x1] }
  0x14   :  { %v139_v16 = vadd.f32 %v138_v59, %v137_v0  ;;  %v664_v59 = vmul.f32 %v43_v49, %v43_v49  ;;  %v253_v60 = vadd.f32 %v252_v40, %v251_v47  ;;  %v105_v0 = vmul.f32 %v635_v42, %v38_v27  ;;  %v709_v27 = vld [vmem:[%s1028_s1 + $0x12] sm:$0x1] }
  0x15   :  { %v680_v6 = vmul.f32 %v655_v55, %v655_v55  ;;  %v256_v8 = vsel %vm122_vm0, %v217_v2, 0.0  ;;  %v690_v13 = vmul.f32 %v669_v61, %v669_v61  ;;  %v106_v20 = vmul.f32 %v660_v56, %v39_v34 }
  0x16   :  { %v141_v29 = vadd.f32 %v140_v9, %v139_v16  ;;  %v686_v9 = vld [vmem:[%s1028_s1 + $0x11] sm:$0x1]  ;;  %v694_v16 = vmul.f32 %v674_v62, %v674_v62  ;;  %v255_v19 = vadd.f32 %v254_v53, %v253_v60  ;;  %v150_v22 = vsel %vm122_vm0, %v104_v50, 0.0 }
  0x17   :  { %v258_v2 = vsel %vm122_vm0, %v218_v10, 0.0  ;;  %v305_v34 = vmul.f32 %v474_v4, %v474_v4  ;;  %v306_v10 = vmul.f32 %v479_v5, %v479_v5  ;;  %v152_v37 = vsel %vm122_vm0, %v105_v0, 0.0 }
  0x18   :  { %v143_v43 = vadd.f32 %v142_v23, %v141_v29  ;;  %v304_v23 = vmul.f32 %v469_v3, %v469_v3  ;;  %v257_v33 = vadd.f32 %v256_v8, %v255_v19  ;;  %v107_v3 = vmul.f32 %v686_v9, %v40_v36 }
  0x19   :  { %v260_v40 = vsel %vm122_vm0, %v219_v17, 0.0  ;;  %v307_v5 = vmul.f32 %v487_v7, %v487_v7  ;;  %v308_v36 = vmul.f32 %v498_v12, %v498_v12  ;;  %v108_v50 = vmul.f32 %v709_v27, %v41_v41 }
  0x1a   :  { %v145_v57 = vadd.f32 %v144_v38, %v143_v43  ;;  %v719_v38 = vmul.f32 %v704_v25, %v704_v25  ;;  %v725_v43 = vld [vmem:[%s1028_s1 + $0x13] sm:$0x1]  ;;  %v259_v4 = vadd.f32 %v258_v2, %v257_v33  ;;  %v262_v17 = vsel %vm122_vm0, %v596_v18, 0.0  ;;  %v762_v33 = vld [vmem:[%s1028_s1 + $0x16] sm:$0x1] }
  0x1b   :  { %v336_v53 = vsel %vm122_vm0, %v304_v23, 0.0  ;;  %v337_v7 = vsel %vm122_vm0, %v305_v34, 0.0  ;;  %v339_v12 = vsel %vm122_vm0, %v306_v10, 0.0  ;;  %v109_v41 = vmul.f32 %v725_v43, %v42_v48 }
  0x1c   :  { %v147_v11 = vadd.f32 %v146_v51, %v145_v57  ;;  %v154_v51 = vsel %vm122_vm0, %v106_v20, 0.0  ;;  %v739_v57 = vld [vmem:[%s1028_s1 + $0x14] sm:$0x1]  ;;  %v261_v0 = vadd.f32 %v260_v40, %v259_v4  ;;  %v264_v18 = vsel %vm122_vm0, %v603_v24, 0.0 }
  0x1d   :  { %v338_v8 = vadd.f32 %v337_v7, %v336_v53  ;;  %v341_v2 = vsel %vm122_vm0, %v307_v5, 0.0  ;;  %v110_v48 = vmul.f32 %v739_v57, %v43_v49  ;;  %v158_v23 = vsel %vm122_vm0, %v108_v50, 0.0 }
  0x1e   :  { %v149_v29 = vadd.f32 %v148_v1, %v147_v11  ;;  %v156_v1 = vsel %vm122_vm0, %v107_v3, 0.0  ;;  %v750_v11 = vld [vmem:[%s1028_s1 + $0x15] sm:$0x1]  ;;  %v263_v20 = vadd.f32 %v262_v17, %v261_v0  ;;  %v266_v24 = vsel %vm122_vm0, %v614_v30, 0.0  ;;  %v788_v17 = vld [vmem:[%s1028_s1 + $0x18] sm:$0x1] }
  0x1f   :  { %v343_v3 = vsel %vm122_vm0, %v308_v36, 0.0  ;;  %v111_v49 = vmul.f32 %v750_v11, %v655_v55  ;;  %v268_v30 = vsel %vm122_vm0, %v616_v32, 0.0  ;;  %v112_v55 = vmul.f32 %v762_v33, %v669_v61 }
  0x20   :  { %v151_v47 = vadd.f32 %v150_v22, %v149_v29  ;;  %v309_v22 = vmul.f32 %v507_v15, %v507_v15  ;;  %v340_v29 = vadd.f32 %v339_v12, %v338_v8  ;;  %v265_v10 = vadd.f32 %v264_v18, %v263_v20 }
  0x21   :  { %v310_v15 = vmul.f32 %v519_v21, %v519_v21  ;;  %v311_v21 = vmul.f32 %v529_v26, %v529_v26  ;;  %v162_v50 = vsel %vm122_vm0, %v110_v48, 0.0  ;;  %v270_v32 = vsel %vm122_vm0, %v626_v39, 0.0 }
  0x22   :  { %v153_v60 = vadd.f32 %v152_v37, %v151_v47  ;;  %v160_v37 = vsel %vm122_vm0, %v109_v41, 0.0  ;;  %v342_v40 = vadd.f32 %v341_v2, %v340_v29  ;;  %v775_v47 = vld [vmem:[%s1028_s1 + $0x17] sm:$0x1]  ;;  %v267_v5 = vadd.f32 %v266_v24, %v265_v10  ;;  %v801_v41 = vld [vmem:[%s1027_s0 + $0x19] sm:$0x1] }
  0x23   :  { %v345_v36 = vsel %vm122_vm0, %v309_v22, 0.0  ;;  %v312_v26 = vmul.f32 %v539_v31, %v539_v31  ;;  %v347_v0 = vsel %vm122_vm0, %v310_v15, 0.0  ;;  %v113_v61 = vmul.f32 %v775_v47, %v674_v62  ;;  %v806_v31 = vld [vmem:[%s1028_s1 + $0x19] sm:$0x1]  ;;  %v819_v2 = vld [vmem:[%s1027_s0 + $0x1a] sm:$0x1] }
  0x24   :  { %v155_v19 = vadd.f32 %v154_v51, %v153_v60  ;;  %v344_v51 = vadd.f32 %v343_v3, %v342_v40  ;;  %v269_v60 = vadd.f32 %v268_v30, %v267_v5  ;;  %v164_v7 = vsel %vm122_vm0, %v111_v49, 0.0  ;;  %v837_v15 = vld [vmem:[%s1027_s0 + $0x1b] sm:$0x1] }
  0x25   :  { %v272_v39 = vsel %vm122_vm0, %v637_v44, 0.0  ;;  %v313_v62 = vmul.f32 %v547_v35, %v547_v35  ;;  %v349_v8 = vsel %vm122_vm0, %v311_v21, 0.0  ;;  %v114_v44 = vmul.f32 %v788_v17, %v704_v25  ;;  %v824_v35 = vld [vmem:[%s1028_s1 + $0x1a] sm:$0x1]  ;;  %v855_v21 = vld [vmem:[%s1027_s0 + $0x1c] sm:$0x1] }
  0x26   :  { %v157_v34 = vadd.f32 %v156_v1, %v155_v19  ;;  %v346_v12 = vadd.f32 %v345_v36, %v344_v51  ;;  %v271_v18 = vadd.f32 %v270_v32, %v269_v60  ;;  %v166_v19 = vsel %vm122_vm0, %v112_v55, 0.0 }
  0x27   :  { %v274_v20 = vsel %vm122_vm0, %v639_v46, 0.0  ;;  %v314_v25 = vmul.f32 %v559_v45, %v559_v45  ;;  %v351_v24 = vsel %vm122_vm0, %v312_v26, 0.0  ;;  %v115_v46 = vmul.f32 %v806_v31, %v801_v41  ;;  %v842_v45 = vld [vmem:[%s1028_s1 + $0x1b] sm:$0x1]  ;;  %v873_v26 = vld [vmem:[%s1027_s0 + $0x1d] sm:$0x1] }
  0x28   :  { %v159_v4 = vadd.f32 %v158_v23, %v157_v34  ;;  %v348_v22 = vadd.f32 %v347_v0, %v346_v12  ;;  %v273_v23 = vadd.f32 %v272_v39, %v271_v18  ;;  %v168_v29 = vsel %vm122_vm0, %v113_v61, 0.0 }
  0x29   :  { %v276_v34 = vsel %vm122_vm0, %v649_v52, 0.0  ;;  %v353_v30 = vsel %vm122_vm0, %v313_v62, 0.0  ;;  %v116_v52 = vmul.f32 %v824_v35, %v819_v2  ;;  %v170_v40 = vsel %vm122_vm0, %v114_v44, 0.0  ;;  %v891_v62 = vld [vmem:[%s1027_s0 + $0x1e] sm:$0x1] }
  0x2a   :  { %v161_v53 = vadd.f32 %v160_v37, %v159_v4  ;;  %v350_v10 = vadd.f32 %v349_v8, %v348_v22  ;;  %v275_v49 = vadd.f32 %v274_v20, %v273_v23  ;;  %v315_v37 = vmul.f32 %v572_v54, %v572_v54  ;;  %v860_v54 = vld [vmem:[%s1028_s1 + $0x1c] sm:$0x1] }
  0x2b   :  { %v278_v4 = vsel %vm122_vm0, %v662_v58, 0.0  ;;  %v355_v32 = vsel %vm122_vm0, %v314_v25, 0.0  ;;  %v117_v58 = vmul.f32 %v842_v45, %v837_v15  ;;  %v172_v51 = vsel %vm122_vm0, %v115_v46, 0.0  ;;  %v909_v25 = vld [vmem:[%s1027_s0 + $0x1f] sm:$0x1] }
  0x2c   :  { %v163_v1 = vadd.f32 %v162_v50, %v161_v53  ;;  %v352_v5 = vadd.f32 %v351_v24, %v350_v10  ;;  %v277_v55 = vadd.f32 %v276_v34, %v275_v49  ;;  %v316_v50 = vmul.f32 %v583_v63, %v583_v63  ;;  %v878_v63 = vld [vmem:[%s1028_s1 + $0x1d] sm:$0x1] }
  0x2d   :  { %v280_v53 = vsel %vm122_vm0, %v664_v59, 0.0  ;;  %v357_v39 = vsel %vm122_vm0, %v315_v37, 0.0  ;;  %v118_v59 = vmul.f32 %v860_v54, %v855_v21  ;;  %v174_v12 = vsel %vm122_vm0, %v116_v52, 0.0 }
  0x2e   :  { %v165_v48 = vadd.f32 %v164_v7, %v163_v1  ;;  %v354_v60 = vadd.f32 %v353_v30, %v352_v5  ;;  %v279_v61 = vadd.f32 %v278_v4, %v277_v55  ;;  %v317_v7 = vmul.f32 %v594_v14, %v594_v14  ;;  %v896_v14 = vld [vmem:[%s1028_s1 + $0x1e] sm:$0x1] }
  0x2f   :  { %v282_v1 = vsel %vm122_vm0, %v680_v6, 0.0  ;;  %v359_v20 = vsel %vm122_vm0, %v316_v50, 0.0  ;;  %v119_v6 = vmul.f32 %v878_v63, %v873_v26  ;;  %v176_v22 = vsel %vm122_vm0, %v117_v58, 0.0 }
  0x30   :  { %v167_v3 = vadd.f32 %v166_v19, %v165_v48  ;;  %v356_v18 = vadd.f32 %v355_v32, %v354_v60  ;;  %v281_v44 = vadd.f32 %v280_v53, %v279_v61  ;;  %v318_v19 = vmul.f32 %v612_v28, %v612_v28  ;;  %v914_v28 = vld [vmem:[%s1028_s1 + $0x1f] sm:$0x1] }
  0x31   :  { %v284_v48 = vsel %vm122_vm0, %v690_v13, 0.0  ;;  %v361_v34 = vsel %vm122_vm0, %v317_v7, 0.0  ;;  %v120_v13 = vmul.f32 %v896_v14, %v891_v62  ;;  %v178_v10 = vsel %vm122_vm0, %v118_v59, 0.0  ;;  %v948_v59 = vld [vmem:[%s1029_s2] sm:$0x1] }
  0x32   :  { %v169_v36 = vadd.f32 %v168_v29, %v167_v3  ;;  %v358_v23 = vadd.f32 %v357_v39, %v356_v18  ;;  %v283_v46 = vadd.f32 %v282_v1, %v281_v44  ;;  %v319_v29 = vmul.f32 %v635_v42, %v635_v42  ;;  %v959_v44 = vld [vmem:[%s1030_s3] sm:$0x1] }
  0x33   :  { %v286_v3 = vsel %vm122_vm0, %v694_v16, 0.0  ;;  %v320_v52 = vmul.f32 %v660_v56, %v660_v56  ;;  %v121_v42 = vmul.f32 %v914_v28, %v909_v25  ;;  %v180_v4 = vsel %vm122_vm0, %v119_v6, 0.0 }
  0x34   :  { %v171_v0 = vadd.f32 %v170_v40, %v169_v36  ;;  %v360_v49 = vadd.f32 %v359_v20, %v358_v23  ;;  %v285_v30 = vadd.f32 %v284_v48, %v283_v46  ;;  %v363_v40 = vsel %vm122_vm0, %v318_v19, 0.0 }
  0x35   :  { %v321_v55 = vmul.f32 %v686_v9, %v686_v9  ;;  %v365_v16 = vsel %vm122_vm0, %v319_v29, 0.0  ;;  %v182_v50 = vsel %vm122_vm0, %v120_v13, 0.0  ;;  %v234_v32 = vmul.f32 %v801_v41, %v801_v41 }
  0x36   :  { %v173_v8 = vadd.f32 %v172_v51, %v171_v0  ;;  %v362_v5 = vadd.f32 %v361_v34, %v360_v49  ;;  %v287_v56 = vadd.f32 %v286_v3, %v285_v30  ;;  %v288_v53 = vsel %vm122_vm0, %v719_v38, 0.0 }
  0x37   :  { %v322_v60 = vmul.f32 %v709_v27, %v709_v27  ;;  %v367_v0 = vsel %vm122_vm0, %v320_v52, 0.0  ;;  %v184_v9 = vsel %vm122_vm0, %v121_v42, 0.0  ;;  %v323_v39 = vmul.f32 %v725_v43, %v725_v43 }
  0x38   :  { %v175_v24 = vadd.f32 %v174_v12, %v173_v8  ;;  %v364_v58 = vadd.f32 %v363_v40, %v362_v5  ;;  %v369_v41 = vsel %vm122_vm0, %v321_v55, 0.0  ;;  %v235_v38 = vmul.f32 %v819_v2, %v819_v2 }
  0x39   :  { %v289_v27 = vadd.f32 %v288_v53, %v287_v56  ;;  %v290_v18 = vsel %vm122_vm0, %v234_v32, 0.0  ;;  %v324_v8 = vmul.f32 %v739_v57, %v739_v57  ;;  %v371_v43 = vsel %vm122_vm0, %v322_v60, 0.0 }
  0x3a   :  { %v177_v37 = vadd.f32 %v176_v22, %v175_v24  ;;  %v366_v61 = vadd.f32 %v365_v16, %v364_v58  ;;  %v325_v2 = vmul.f32 %v750_v11, %v750_v11  ;;  %v373_v6 = vsel %vm122_vm0, %v323_v39, 0.0 }
  0x3b   :  { %v188_v22 = vstv %s1031_s4  ;;  %v236_v57 = vmul.f32 %v837_v15, %v837_v15  ;;  %v291_v48 = vadd.f32 %v290_v18, %v289_v27  ;;  %v292_v46 = vsel %vm122_vm0, %v235_v38, 0.0 }
  0x3c   :  { %v179_v36 = vadd.f32 %v178_v10, %v177_v37  ;;  %v368_v12 = vadd.f32 %v367_v0, %v366_v61  ;;  %v326_v29 = vmul.f32 %v762_v33, %v762_v33  ;;  %v375_v11 = vsel %vm122_vm0, %v324_v8, 0.0 }
  0x3d   :  { %v327_v10 = vmul.f32 %v775_v47, %v775_v47  ;;  %v377_v3 = vsel %vm122_vm0, %v325_v2, 0.0  ;;  %v237_v15 = vmul.f32 %v855_v21, %v855_v21  ;;  %v293_v49 = vadd.f32 %v292_v46, %v291_v48 }
  0x3e   :  { %v181_v51 = vadd.f32 %v180_v4, %v179_v36  ;;  %v370_v19 = vadd.f32 %v369_v41, %v368_v12  ;;  %v294_v52 = vsel %vm122_vm0, %v236_v57, 0.0  ;;  %v328_v33 = vmul.f32 %v788_v17, %v788_v17 }
  0x3f   :  { %v379_v40 = vsel %vm122_vm0, %v326_v29, 0.0  ;;  %v329_v47 = vmul.f32 %v806_v31, %v806_v31  ;;  %v381_v4 = vsel %vm122_vm0, %v327_v10, 0.0  ;;  %v295_v5 = vadd.f32 %v294_v52, %v293_v49 }
  0x40   :  { %v183_v7 = vadd.f32 %v182_v50, %v181_v51  ;;  %v372_v23 = vadd.f32 %v371_v43, %v370_v19  ;;  %v238_v21 = vmul.f32 %v873_v26, %v873_v26  ;;  %v296_v55 = vsel %vm122_vm0, %v237_v15, 0.0 }
  0x41   :  { %v330_v16 = vmul.f32 %v824_v35, %v824_v35  ;;  %v383_v17 = vsel %vm122_vm0, %v328_v33, 0.0  ;;  %v331_v32 = vmul.f32 %v842_v45, %v842_v45  ;;  %v385_v31 = vsel %vm122_vm0, %v329_v47, 0.0 }
  0x42   :  { %v185_v1 = vadd.f32 %v184_v9, %v183_v7  ;;  %v374_v34 = vadd.f32 %v373_v6, %v372_v23  ;;  %v197_v56 = vlaneseq  ;;  %v297_v58 = vadd.f32 %v296_v55, %v295_v5 }
  0x43   :  { %v239_v53 = vmul.f32 %v891_v62, %v891_v62  ;;  %v298_v26 = vsel %vm122_vm0, %v238_v21, 0.0  ;;  %v332_v60 = vmul.f32 %v860_v54, %v860_v54  ;;  %v387_v35 = vsel %vm122_vm0, %v330_v16, 0.0 }
  0x44   :  { %v186_v20 = vadd.f32 %v185_v1, %v948_v59  ;;  %v376_v37 = vadd.f32 %v375_v11, %v374_v34  ;;  %v333_v9 = vmul.f32 %v878_v63, %v878_v63  ;;  %v389_v45 = vsel %vm122_vm0, %v331_v32, 0.0 }
  0x45   :  { %v198_v61 = vshrl.u32 %v197_v56, 7  ;;  %v299_v7 = vadd.f32 %v298_v26, %v297_v58  ;;  %v240_v41 = vmul.f32 %v909_v25, %v909_v25  ;;  %v300_v62 = vsel %vm122_vm0, %v239_v53, 0.0 }
  0x46   :  { %v187_v24 = vadd.f32 %v186_v20, %v959_v44  ;;  %v378_v42 = vadd.f32 %v377_v3, %v376_v37  ;;  %v334_v38 = vmul.f32 %v896_v14, %v896_v14  ;;  %v391_v54 = vsel %vm122_vm0, %v332_v60, 0.0 }
  0x47   :  { %v335_v12 = vmul.f32 %v914_v28, %v914_v28  ;;  %v393_v63 = vsel %vm122_vm0, %v333_v9, 0.0  ;;  %v200_v18 = vand.u32 127, %v197_v56  ;;  %v202_v8 = vmul.u32 128, %v198_v61 }
  0x48   :  { %v189_v13 = vadd.f32 %v188_v22, %v187_v24  ;;  %v380_v36 = vadd.f32 %v379_v40, %v378_v42  ;;  %v301_v43 = vadd.f32 %v300_v62, %v299_v7  ;;  %v302_v25 = vsel %vm122_vm0, %v240_v41, 0.0 }
  0x49   :  { %v395_v2 = vsel %vm122_vm0, %v334_v38, 0.0  ;;  %v397_v14 = vsel %vm122_vm0, %v335_v12, 0.0  ;;  %v205_v22 = vadd.s32 %v202_v8, %v200_v18  ;;  %v400_v23 = vmul.f32 %v948_v59, %v948_v59 }
  0x4a   :  { %v414_v30 = vmul.f32 -1.442695, %v189_v13  ;;  %v382_v50 = vadd.f32 %v381_v4, %v380_v36  ;;  %v303_v57 = vadd.f32 %v302_v25, %v301_v43  ;;  %v402_v46 = vmul.f32 %v959_v44, %v959_v44 }
  0x4b   :  { %vm206_vm1 = vcmp.lt.s32.totalorder %v205_v22, 8  ;;  %v421_v11 = vmov 0.0  }
  0x4c   :  { %417 = vpow2.f32 %v414_v30  ;;  %v384_v51 = vadd.f32 %v383_v17, %v382_v50  ;;  %v415_v34 = vsel %vm206_vm1, 1.0, %v421_v11 }
  0x4e   :  { %v386_v0 = vadd.f32 %v385_v31, %v384_v51 }
  0x50   :  { %v388_v39 = vadd.f32 %v387_v35, %v386_v0 }
  0x52   :  { %v390_v27 = vadd.f32 %v389_v45, %v388_v39 }
  0x54   :  { %v392_v19 = vadd.f32 %v391_v54, %v390_v27 }
  0x56   :  { %v394_v6 = vadd.f32 %v393_v63, %v392_v19 }
  0x58   :  { %v396_v48 = vadd.f32 %v395_v2, %v394_v6 }
  0x59   :  { %v418_v1 = vpop.eup %417 }
  0x5a   :  { %v193_v20 = vadd.f32 1.0, %v418_v1  ;;  %v398_v28 = vadd.f32 %v397_v14, %v396_v48 }
  0x5c   :  { %419 = vrcp.f32 %v193_v20  ;;  %v399_v24 = vadd.f32 %v398_v28, %v303_v57 }
  0x5e   :  { %v401_v29 = vadd.f32 %v400_v23, %v399_v24 }
  0x60   :  { %v403_v13 = vadd.f32 %v402_v46, %v401_v29 }
  0x62   :  { %v404_v10 = vmul.f32 %v415_v34, %v403_v13 }
  0x64   :  { %405 = vst [vmem:[%s1032_s6] sm:$0x1] %v404_v10 }
  0x69   :  { %v420_v3 = vpop.eup %419 }
  0x6a   :  { %196 = vst [vmem:[%s1033_s5] sm:$0x1] %v420_v3 }

</bundles_post_ra>
